<compile_context>
chip_gen: v5e
topology: v5e:2x2
jax: 0.10.0
libtpu: 0.0.40
codegen_flags: <defaults>
</compile_context>

<pallas_src>
import functools

import jax
import jax.numpy as jnp
from jax.experimental import pallas as pl
from jax.experimental.pallas import tpu as pltpu


def _pooler_kernel(x_ref, w_ref, b_ref, out_ref):
    # x_ref  : (bt, H)     VMEM   CLS rows (native feature dtype, e.g. bf16)
    # w_ref  : (H, C_pad)  VMEM   pre-transposed classifier weight (feature dtype)
    # b_ref  : (1, C_pad)  VMEM   f32 bias (zero-padded columns)
    # out_ref: (bt, C_pad) VMEM   logits in the feature dtype
    acc = jnp.dot(x_ref[...], w_ref[...],
                  preferred_element_type=jnp.float32)   # f32 accumulation on MXU
    out_ref[...] = (acc + b_ref[...]).astype(out_ref.dtype)


def prepare_pooler_params(weight, bias, feat_dtype):
    """One-time classifier-parameter prep (do at model load, NOT per forward).

    weight: [C, H] (torch nn.Linear convention), bias: [C]
    returns (w_t [H, C_pad] in feat_dtype, b2 [1, C_pad] f32)
    """
    C, H = weight.shape
    C_pad = pl.cdiv(C, 128) * 128          # lane-dense output columns
    w_t = jnp.zeros((H, C_pad), dtype=feat_dtype).at[:, :C].set(
        weight.T.astype(feat_dtype))
    b2 = jnp.zeros((1, C_pad), dtype=jnp.float32).at[:, :C].set(
        bias.astype(jnp.float32))
    return w_t, b2


def _choose_block_b(B, block_b_max=2048):
    """Batch rows per grid step.

    * Tiny batch: one block equal to the full batch dim (always layout-legal).
    * Otherwise: >=2 sublane-aligned steps (v7x 2-TC sharding via "parallel"),
      as fat as possible (per-step overhead ~0.35us), capped at block_b_max.
    """
    if B <= 8:
        return B
    bt = -(-B // 2)                 # cdiv(B, 2)  -> at least 2 grid steps
    bt = ((bt + 7) // 8) * 8        # round up to a sublane multiple
    return min(bt, block_b_max)


def pooler_forward(features, w_t, b2, *, n_classes, block_b_max=2048):
    """features: [B, S, H]  (any float dtype; bf16 recommended)
       w_t     : [H, C_pad] pre-transposed/padded weight (from prepare_pooler_params)
       b2      : [1, C_pad] padded f32 bias
       returns : [B, n_classes] logits in the feature dtype
    """
    B, S, H = features.shape
    C_pad = w_t.shape[1]
    out_dtype = features.dtype

    # Free contiguous view: columns 0..H-1 of each row == token 0 (CLS).
    # The input BlockSpec below selects exactly that window, so the kernel's
    # DMA is the only read of the CLS rows (no wrapper-side slice pass).
    feats2d = features.reshape(B, S * H)

    bt = _choose_block_b(B, block_b_max)
    grid = (pl.cdiv(B, bt),)

    feat_bytes = jnp.dtype(features.dtype).itemsize
    out_bytes = jnp.dtype(out_dtype).itemsize
    cost = pl.CostEstimate(
        flops=2 * B * H * C_pad,
        transcendentals=0,
        bytes_accessed=(B * H * feat_bytes            # CLS rows in
                        + H * C_pad * feat_bytes      # weight in
                        + C_pad * 4                   # bias in
                        + B * C_pad * out_bytes),     # logits out
    )

    out = pl.pallas_call(
        _pooler_kernel,
        out_shape=jax.ShapeDtypeStruct((B, C_pad), out_dtype),
        grid=grid,
        in_specs=[
            # (bt, H) window at block index (i, 0): rows [i*bt, i*bt+bt),
            # columns [0, H) of [B, S*H]  ==  CLS token of each batch row.
            pl.BlockSpec((bt, H), lambda i: (i, 0)),
            pl.BlockSpec((H, C_pad), lambda i: (0, 0)),
            pl.BlockSpec((1, C_pad), lambda i: (0, 0)),
        ],
        out_specs=pl.BlockSpec((bt, C_pad), lambda i: (i, 0)),
        compiler_params=pltpu.CompilerParams(
            dimension_semantics=("parallel",),
        ),
        cost_estimate=cost,
    )(feats2d, w_t, b2)

    return out[:, :n_classes]


if __name__ == "__main__":
    # Small, deterministic shapes consistent with the module:
    # hidden = 768 (fixed by the classifier Linear), batch = 2, seq = 8,
    # n_classes = 4.
    B, S, H, C = 2, 8, 768, 4

    key = jax.random.PRNGKey(0)
    k_feat, k_w, k_b = jax.random.split(key, 3)

    # Synthetic "RoBERTa features" (stand-in for extract_features output),
    # kept in bf16 — the kernel consumes them without any wrapper upcast.
    features = jax.random.normal(k_feat, (B, S, H), dtype=jnp.float32)
    features = features.astype(jnp.bfloat16)

    # Deterministic nn.Linear(768, n_classes)-style init: U(-1/sqrt(H), 1/sqrt(H)).
    bound = 1.0 / (H ** 0.5)
    weight = jax.random.uniform(k_w, (C, H), minval=-bound, maxval=bound,
                                dtype=jnp.float32)
    bias = jax.random.uniform(k_b, (C,), minval=-bound, maxval=bound,
                              dtype=jnp.float32)

    # One-time parameter prep — hoisted out of the per-call path.
    w_t, b2 = jax.block_until_ready(
        prepare_pooler_params(weight, bias, features.dtype))

    fwd = jax.jit(functools.partial(pooler_forward, n_classes=C))
    out = jax.block_until_ready(fwd(features, w_t, b2))

    # Reference in plain JAX, mirroring the kernel math (bf16 operands,
    # f32 accumulation, f32 bias add); kernel additionally casts the result
    # back to bf16.
    cls = features[:, 0, :]
    ref = jnp.dot(cls, weight.T.astype(cls.dtype),
                  preferred_element_type=jnp.float32) + bias

    assert out.shape == (B, C)
    assert out.dtype == features.dtype
    assert jnp.allclose(out.astype(jnp.float32), ref, atol=1e-2, rtol=1e-2)

    print("KERNEL_OK")
</pallas_src>

<mosaic_0001>
module attributes {stable_mosaic.version = 11 : i64} {
  func.func @_pooler_kernel(%arg0: i32, %arg1: memref<2x768xbf16, #tpu.memory_space<vmem>>, %arg2: memref<768x128xbf16, #tpu.memory_space<vmem>>, %arg3: memref<1x128xf32, #tpu.memory_space<vmem>>, %arg4: memref<2x128xbf16, #tpu.memory_space<vmem>>) attributes {dimension_semantics = [#tpu.dimension_semantics<parallel>], iteration_bounds = array<i64: 1>, scalar_prefetch = 0 : i64, scratch_operands = 0 : i64, tpu.core_type = #tpu.core_type<tc>, window_params = [{transform_indices = @transform_0, window_bounds = array<i64: 2, 768>}, {pipeline_mode = #tpu.pipeline_mode<synchronous>, transform_indices = @transform_1, window_bounds = array<i64: 768, 128>}, {pipeline_mode = #tpu.pipeline_mode<synchronous>, transform_indices = @transform_2, window_bounds = array<i64: 1, 128>}, {transform_indices = @transform_3, window_bounds = array<i64: 2, 128>}]} {
    %c0 = arith.constant 0 : index
    %c0_0 = arith.constant 0 : index
    %0 = vector.load %arg1[%c0, %c0_0] : memref<2x768xbf16, #tpu.memory_space<vmem>>, vector<2x768xbf16>
    %c0_1 = arith.constant 0 : index
    %c0_2 = arith.constant 0 : index
    %1 = vector.load %arg2[%c0_1, %c0_2] : memref<768x128xbf16, #tpu.memory_space<vmem>>, vector<768x128xbf16>
    %cst = arith.constant dense<0.000000e+00> : vector<2x128xf32>
    %2 = tpu.matmul %0, %1, %cst {dimension_numbers = #tpu.dot_dimension_numbers<[1], [0], [0], [1], [0, 0, 1, 1], [], []>} : vector<2x768xbf16>, vector<768x128xbf16>, vector<2x128xf32> -> vector<2x128xf32>
    %c0_3 = arith.constant 0 : index
    %c0_4 = arith.constant 0 : index
    %3 = vector.load %arg3[%c0_3, %c0_4] : memref<1x128xf32, #tpu.memory_space<vmem>>, vector<1x128xf32>
    %4 = vector.broadcast %3 : vector<1x128xf32> to vector<2x128xf32>
    %5 = arith.addf %2, %4 : vector<2x128xf32>
    %6 = arith.truncf %5 : vector<2x128xf32> to vector<2x128xbf16>
    %c0_5 = arith.constant 0 : index
    %c0_6 = arith.constant 0 : index
    %7 = vector.load %arg4[%c0_5, %c0_6] : memref<2x128xbf16, #tpu.memory_space<vmem>>, vector<2x128xbf16>
    tpu.vector_store %arg4[%c0_5, %c0_6], %6 {strides = array<i32>} : memref<2x128xbf16, #tpu.memory_space<vmem>>, vector<2x128xbf16>,
    return
  }
  func.func @transform_0(%arg0: i32) -> (i32, i32) {
    %c0_i32 = arith.constant 0 : i32
    %c0_i32_0 = arith.constant 0 : i32
    return %arg0, %c0_i32 : i32, i32
  }
  func.func @transform_1(%arg0: i32) -> (i32, i32) {
    %c0_i32 = arith.constant 0 : i32
    %c0_i32_0 = arith.constant 0 : i32
    %c0_i32_1 = arith.constant 0 : i32
    return %c0_i32, %c0_i32_0 : i32, i32
  }
  func.func @transform_2(%arg0: i32) -> (i32, i32) {
    %c0_i32 = arith.constant 0 : i32
    %c0_i32_0 = arith.constant 0 : i32
    %c0_i32_1 = arith.constant 0 : i32
    return %c0_i32, %c0_i32_0 : i32, i32
  }
  func.func @transform_3(%arg0: i32) -> (i32, i32) {
    %c0_i32 = arith.constant 0 : i32
    %c0_i32_0 = arith.constant 0 : i32
    return %arg0, %c0_i32 : i32, i32
  }
}

</mosaic_0001>

<bundles_post_ra>
// kernel: pooler_forward.1
= control target key start
LH: loop header
LB: loop body
LE: loop exit
PB: predicated region body
PF: predicated region fallthrough
CT: control target
= control target key end

     0   :  { %8 = vsyncpa [#allocation3], 0  ;;  %s864_s0 = inlined_call_operand.vmem [shape: bf16[2,6144], index: 0, kind: input, shape index: {}]   ;;  %s865_s1 = inlined_call_operand.hbm [shape: bf16[768,128], index: 1, kind: input, shape index: {}]   ;;  %s866_s2 = inlined_call_operand.vmem [shape: f32[1,128], index: 2, kind: input, shape index: {}]   ;;  %s867_s3 = inlined_call_operand.hbm [shape: bf16[2,128], index: 3, kind: output, shape index: {}]  }
   0x1   :  { %9 = vsyncpa [#allocation4], 0  ;;  %s16_s14 = sshll.u32 %s865_s1, 4  ;;  %s828_s15 = smov [#allocation2]   ;;  %s17_s14 = int_to_ptr.hbm [resolvable:$true] %s16_s14 }
   0x2   :  { %s18_s16 = sshll.u32 %s828_s15, 4  ;;  %s829_s17 = smov 64   ;;  %s19_s16 = int_to_ptr.vmem [resolvable:$true] %s18_s16 }
   0x3   :  { %s830_s18 = smov 4  }
   0x4   :  { %24 = dma.hbm_to_vmem [thread:$0]  %s17_s14, 6144, %s19_s16, [#allocation3], %s829_s17, %s829_s17, %s830_s18  }
   0x5   :  { %824 = dma.done.wait [#allocation3], 6144  }
   0x6   :  { %825 = vsyncadd [#allocation3], 4294961152  ;;  %v730_v0 = vld [vmem:[#allocation2 + $0x38] sm:$0xff]  ;;  %v729_v2 = vld [vmem:[#allocation2 + $0x30] sm:$0xff]  ;;  %s831_s21 = smov [#allocation5]   ;;  %s521_s25 = sshll.u32 %s867_s3, 4  ;;  %s522_s25 = int_to_ptr.hbm [resolvable:$true] %s521_s25 }
   0x7   :  { %v738_v1 = vld [vmem:[#allocation2 + $0x78] sm:$0xff]  ;;  %434 = vmatpush.bf16.msra.mxu0 %v730_v0  ;;  %v737_v3 = vld [vmem:[#allocation2 + $0x70] sm:$0xff]  ;;  %v728_v8 = vld [vmem:[#allocation2 + $0x28] sm:$0xff]  ;;  %s519_s22 = sshll.u32 %s831_s21, 4  ;;  %s520_s22 = int_to_ptr.vmem [resolvable:$true] %s519_s22 }
   0x8   :  { %447 = vmatpush.bf16.msra.mxu1 %v738_v1  ;;  %v746_v4 = vld [vmem:[#allocation2 + $0xb8] sm:$0xff]  ;;  %v745_v6 = vld [vmem:[#allocation2 + $0xb0] sm:$0xff]  ;;  %v736_v9 = vld [vmem:[#allocation2 + $0x68] sm:$0xff] }
   0x9   :  { %v754_v5 = vld [vmem:[#allocation2 + $0xf8] sm:$0xff]  ;;  %460 = vmatpush.bf16.msra.mxu2 %v746_v4  ;;  %v753_v7 = vld [vmem:[#allocation2 + $0xf0] sm:$0xff]  ;;  %v744_v10 = vld [vmem:[#allocation2 + $0xa8] sm:$0xff] }
   0xa   :  { %473 = vmatpush.bf16.msra.mxu3 %v754_v5  ;;  %v752_v11 = vld [vmem:[#allocation2 + $0xe8] sm:$0xff]  ;;  %v727_v12 = vld [vmem:[#allocation2 + $0x20] sm:$0xff]  ;;  %v31_v14 = vld [vmem:[%s864_s0] sm:$0x3f] }
   0xb   :  { %435 = vmatpush.bf16.msra.mxu0 %v729_v2  ;;  %v735_v13 = vld [vmem:[#allocation2 + $0x60] sm:$0xff]  ;;  %133 = vst [vmem:[#allocation1] ss:$9 sm:$0xff] %v31_v14  ;;  %v726_v17 = vld [vmem:[#allocation2 + $0x18] sm:$0xff]  ;;  %v725_v21 = vld [vmem:[#allocation2 + $0x10] sm:$0xff] }
   0xc   :  { %448 = vmatpush.bf16.msra.mxu1 %v737_v3  ;;  %v743_v15 = vld [vmem:[#allocation2 + $0xa0] sm:$0xff]  ;;  %v734_v18 = vld [vmem:[#allocation2 + $0x58] sm:$0xff]  ;;  %v733_v22 = vld [vmem:[#allocation2 + $0x50] sm:$0xff] }
   0xd   :  { %461 = vmatpush.bf16.msra.mxu2 %v745_v6  ;;  %v751_v16 = vld [vmem:[#allocation2 + $0xe0] sm:$0xff]  ;;  %v742_v19 = vld [vmem:[#allocation2 + $0x98] sm:$0xff]  ;;  %v741_v23 = vld [vmem:[#allocation2 + $0x90] sm:$0xff] }
   0xe   :  { %474 = vmatpush.bf16.msra.mxu3 %v753_v7  ;;  %v750_v20 = vld [vmem:[#allocation2 + $0xd8] sm:$0xff]  ;;  %v749_v24 = vld [vmem:[#allocation2 + $0xd0] sm:$0xff]  ;;  %v724_v25 = vld [vmem:[#allocation2 + $0x8] sm:$0xff] }
   0xf   :  { %436 = vmatpush.bf16.msra.mxu0 %v728_v8  ;;  %v732_v26 = vld [vmem:[#allocation2 + $0x48] sm:$0xff]  ;;  %v723_v29 = vld [vmem:[#allocation2] sm:$0xff]  ;;  %v762_v31 = vld [vmem:[#allocation2 + $0x138] sm:$0xff] }
  0x10   :  { %449 = vmatpush.bf16.msra.mxu1 %v736_v9  ;;  %v740_v27 = vld [vmem:[#allocation2 + $0x88] sm:$0xff]  ;;  %v731_v30 = vld [vmem:[#allocation2 + $0x40] sm:$0xff]  ;;  %v770_v32 = vld [vmem:[#allocation2 + $0x178] sm:$0xff] }
  0x11   :  { %462 = vmatpush.bf16.msra.mxu2 %v744_v10  ;;  %v748_v28 = vld [vmem:[#allocation2 + $0xc8] sm:$0xff]  ;;  %v739_v33 = vld [vmem:[#allocation2 + $0x80] sm:$0xff]  ;;  %v761_v37 = vld [vmem:[#allocation2 + $0x130] sm:$0xff] }
  0x12   :  { %475 = vmatpush.bf16.msra.mxu3 %v752_v11  ;;  %v747_v34 = vld [vmem:[#allocation2 + $0xc0] sm:$0xff]  ;;  %v134_v35 = vld [vmem:[#allocation1] sm:$0xff]  ;;  %v769_v38 = vld [vmem:[#allocation2 + $0x170] sm:$0xff] }
  0x13   :  { %437 = vmatpush.bf16.msra.mxu0 %v727_v12  ;;  %v135_v36 = vld [vmem:[#allocation1 + $0x9] sm:$0xff]  ;;  %v136_v39 = vld [vmem:[#allocation1 + $0x12] sm:$0xff]  ;;  %v137_v40 = vld [vmem:[#allocation1 + $0x1b] sm:$0xff] }
  0x14   :  { %450 = vmatpush.bf16.msra.mxu1 %v735_v13  ;;  %v760_v41 = vld [vmem:[#allocation2 + $0x128] sm:$0xff]  ;;  %v759_v43 = vld [vmem:[#allocation2 + $0x120] sm:$0xff]  ;;  %v758_v45 = vld [vmem:[#allocation2 + $0x118] sm:$0xff] }
  0x15   :  { %463 = vmatpush.bf16.msra.mxu2 %v743_v15  ;;  %v768_v42 = vld [vmem:[#allocation2 + $0x168] sm:$0xff]  ;;  %v767_v44 = vld [vmem:[#allocation2 + $0x160] sm:$0xff]  ;;  %v766_v46 = vld [vmem:[#allocation2 + $0x158] sm:$0xff] }
  0x16   :  { %476 = vmatpush.bf16.msra.mxu3 %v751_v16  ;;  %v757_v47 = vld [vmem:[#allocation2 + $0x110] sm:$0xff]  ;;  %v756_v49 = vld [vmem:[#allocation2 + $0x108] sm:$0xff]  ;;  %v755_v51 = vld [vmem:[#allocation2 + $0x100] sm:$0xff] }
  0x17   :  { %438 = vmatpush.bf16.msra.mxu0 %v726_v17  ;;  %v765_v48 = vld [vmem:[#allocation2 + $0x150] sm:$0xff]  ;;  %v764_v50 = vld [vmem:[#allocation2 + $0x148] sm:$0xff]  ;;  %v763_v52 = vld [vmem:[#allocation2 + $0x140] sm:$0xff] }
  0x18   :  { %451 = vmatpush.bf16.msra.mxu1 %v734_v18  ;;  %v138_v53 = vld [vmem:[#allocation1 + $0x24] sm:$0xff]  ;;  %v139_v54 = vld [vmem:[#allocation1 + $0x2d] sm:$0xff]  ;;  %v775_v61 = vld [vmem:[%s866_s2] ss:$0 sm:$0xff] }
  0x19   :  { %464 = vmatpush.bf16.msra.mxu2 %v742_v19 }
  0x1a   :  { %477 = vmatpush.bf16.msra.mxu3 %v750_v20 }
  0x1b   :  { %439 = vmatpush.bf16.msra.mxu0 %v725_v21 }
  0x1c   :  { %452 = vmatpush.bf16.msra.mxu1 %v733_v22 }
  0x1d   :  { %465 = vmatpush.bf16.msra.mxu2 %v741_v23 }
  0x1e   :  { %478 = vmatpush.bf16.msra.mxu3 %v749_v24 }
  0x1f   :  { %440 = vmatpush.bf16.msra.mxu0 %v724_v25 }
  0x20   :  { %453 = vmatpush.bf16.msra.mxu1 %v732_v26 }
  0x21   :  { %466 = vmatpush.bf16.msra.mxu2 %v740_v27 }
  0x22   :  { %479 = vmatpush.bf16.msra.mxu3 %v748_v28 }
  0x23   :  { %441 = vmatpush.bf16.msra.mxu0 %v723_v29 }
  0x24   :  { %454 = vmatpush.bf16.msra.mxu1 %v731_v30 }
  0x25   :  { %467 = vmatpush.bf16.msra.mxu2 %v739_v33 }
  0x26   :  { %480 = vmatpush.bf16.msra.mxu3 %v747_v34  ;;  %442 = vmatmul.bf16.vlgmr.msra.gmra.mxu0 %v134_v35 }
  0x27   :  { %486 = vmatpush.bf16.msrb.mxu0 %v762_v31  ;;  %455 = vmatmul.bf16.vlgmr.msra.gmra.mxu1 %v135_v36 }
  0x28   :  { %499 = vmatpush.bf16.msrb.mxu1 %v770_v32  ;;  %468 = vmatmul.bf16.vlgmr.msra.gmra.mxu2 %v136_v39 }
  0x29   :  { %481 = vmatmul.bf16.vlgmr.msra.gmra.mxu3 %v137_v40 }
  0x2b   :  { %487 = vmatpush.bf16.msrb.mxu0 %v761_v37 }
  0x2c   :  { %500 = vmatpush.bf16.msrb.mxu1 %v769_v38 }
  0x2f   :  { %488 = vmatpush.bf16.msrb.mxu0 %v760_v41 }
  0x30   :  { %501 = vmatpush.bf16.msrb.mxu1 %v768_v42 }
  0x33   :  { %489 = vmatpush.bf16.msrb.mxu0 %v759_v43 }
  0x34   :  { %502 = vmatpush.bf16.msrb.mxu1 %v767_v44 }
  0x37   :  { %490 = vmatpush.bf16.msrb.mxu0 %v758_v45 }
  0x38   :  { %503 = vmatpush.bf16.msrb.mxu1 %v766_v46 }
  0x3b   :  { %491 = vmatpush.bf16.msrb.mxu0 %v757_v47 }
  0x3c   :  { %504 = vmatpush.bf16.msrb.mxu1 %v765_v48 }
  0x3f   :  { %492 = vmatpush.bf16.msrb.mxu0 %v756_v49 }
  0x40   :  { %505 = vmatpush.bf16.msrb.mxu1 %v764_v50 }
  0x43   :  { %493 = vmatpush.bf16.msrb.mxu0 %v755_v51 }
  0x44   :  { %506 = vmatpush.bf16.msrb.mxu1 %v763_v52 }
  0x46   :  { %494 = vmatmul.bf16.vlgmr.msrb.gmra.mxu0 %v138_v53 }
  0x47   :  { %507 = vmatmul.bf16.vlgmr.msrb.gmra.mxu1 %v139_v54 }
  0xa3   :  { %v443_v55 = vpop.f32.mrf.mxu0 }
  0xa4   :  { %v456_v56 = vpop.f32.mrf.mxu1  ;;  %v444_v62 = vadd.f32 %v775_v61, %v443_v55 }
  0xa6   :  { %v457_v1 = vadd.f32 %v456_v56, %v444_v62 }
  0xab   :  { %v445_v57 = vpop.f32.mrf.mxu0  ;;  %v469_v59 = vpop.f32.mrf.mxu2 }
  0xac   :  { %v458_v58 = vpop.f32.mrf.mxu1  ;;  %v482_v60 = vpop.f32.mrf.mxu3  ;;  %v470_v2 = vadd.f32 %v469_v59, %v457_v1 }
  0xae   :  { %v483_v3 = vadd.f32 %v482_v60, %v470_v2 }
  0xb3   :  { %v471_v63 = vpop.f32.mrf.mxu2 }
  0xb4   :  { %v484_v0 = vpop.f32.mrf.mxu3 }
  0xc3   :  { %v495_v4 = vpop.f32.mrf.mxu0 }
  0xc4   :  { %v508_v5 = vpop.f32.mrf.mxu1  ;;  %v496_v6 = vadd.f32 %v495_v4, %v483_v3 }
  0xc6   :  { %v509_v7 = vadd.f32 %v508_v5, %v496_v6 }
  0xc8   :  { %v512_v8 = vpack.c.bf16 %v509_v7, %v509_v7 }
  0xca   :  { %513 = vst [vmem:[#allocation5] sm:$0x1] %v512_v8 }
  0xcb   :  { %v497_v9 = vpop.f32.mrf.mxu0  ;;  %524 = dma.vmem_to_hbm [thread:$0]  %s520_s22, 16, %s522_s25, [#allocation4]  }
  0xcc   :  { %v510_v10 = vpop.f32.mrf.mxu1 }
  0xcd   :  { %826 = dma.done.wait [#allocation4], 16  }
  0xce   :  { %827 = vsyncadd [#allocation4], 4294967280 }
  0xcf   :  { %529 = vsyncpa [#allocation3], 1 }
  0xd0   :  { %530 = vsyncpa [#allocation4], 1 }

</bundles_post_ra>
